<compile_context>
chip_gen: v7x
topology: tpu7x:2x2x1
jax: 0.10.0
libtpu: 0.0.40
codegen_flags: <defaults>
</compile_context>

<pallas_src>
import math
import functools

import jax
import jax.numpy as jnp
from jax.experimental import pallas as pl
from jax.experimental.pallas import tpu as pltpu

_LANE = 128      # TPU vreg lane width (last dim)
_SUBLANE = 8     # f32 sublane count (second-to-last dim)


# ---------------------------------------------------------------------------
# Small padding helpers
# ---------------------------------------------------------------------------

def _round_up(n, m):
    return ((n + m - 1) // m) * m


def _pad_axis(a, axis, target):
    pad = target - a.shape[axis]
    if pad == 0:
        return a
    widths = [(0, 0)] * a.ndim
    widths[axis] = (0, pad)
    return jnp.pad(a, widths)


# ---------------------------------------------------------------------------
# Fused Pallas kernel: all hidden (Linear + BN-folded + ReLU) layers + header Linear.
# Weights are a single stacked bf16 buffer; biases a single stacked f32 buffer.
# ---------------------------------------------------------------------------

def _make_block_kernel(dins):
    """dins: static tuple of per-layer true input dims (hidden..., header)."""
    n_layers = len(dins)
    num_hidden = n_layers - 1

    # Static row offsets of each layer's weight chunk in the stacked buffer
    # (each chunk's Din is padded to a multiple of 8 at fold time).
    offs = []
    off = 0
    for d in dins:
        offs.append(off)
        off += _round_up(d, _SUBLANE)

    def kernel(x_ref, w_ref, b_ref, o_ref):
        x = x_ref[...]                                   # f32 activations
        for i in range(n_layers):
            din = dins[i]
            # Static slice (offsets are multiples of 8 -> no tile-boundary copy).
            w = w_ref[pl.ds(offs[i], din), :]            # bf16 [din, Dout_pad]
            xk = x[:, :din].astype(jnp.bfloat16)         # bf16 matmul operand only
            y = jnp.dot(xk, w, preferred_element_type=jnp.float32) + b_ref[i]
            if i < num_hidden:
                x = jnp.maximum(y, 0.0)                  # ReLU; Dropout(eval) == identity
            else:
                o_ref[...] = y.astype(o_ref.dtype)       # header output

    return kernel


def fused_block_call(x, w_stack, b_stack, dins):
    """Single gridless pallas_call over the whole Block; everything resident in VMEM."""
    kernel = _make_block_kernel(dins)
    b = x.shape[0]
    dout_pad = w_stack.shape[1]

    flops = 2 * b * sum(int(d) * dout_pad for d in dins)
    bytes_accessed = (int(x.size) * 4 + int(w_stack.size) * 2
                      + int(b_stack.size) * 4 + b * dout_pad * 4)

    return pl.pallas_call(
        kernel,
        out_shape=jax.ShapeDtypeStruct((b, dout_pad), jnp.float32),
        in_specs=[pl.BlockSpec(memory_space=pltpu.MemorySpace.VMEM)] * 3,
        out_specs=pl.BlockSpec(memory_space=pltpu.MemorySpace.VMEM),
        cost_estimate=pl.CostEstimate(flops=flops, transcendentals=0,
                                      bytes_accessed=bytes_accessed),
        # Gridless on purpose: tiny problem; a grid / megacore split would be pure
        # per-step overhead here (see review). Add a batch-only grid when batch is
        # large enough to stream rows against VMEM-resident weights.
    )(x, w_stack, b_stack)


# ---------------------------------------------------------------------------
# Parameter construction (deterministic; mimics PyTorch default inits)
# ---------------------------------------------------------------------------

def _init_linear(key, d_in, d_out, dtype=jnp.float32):
    # PyTorch nn.Linear default: U(-1/sqrt(fan_in), 1/sqrt(fan_in)) for W and b.
    kw, kb = jax.random.split(key)
    bound = 1.0 / math.sqrt(d_in)
    w = jax.random.uniform(kw, (d_out, d_in), dtype, -bound, bound)  # [out, in]
    b = jax.random.uniform(kb, (d_out,), dtype, -bound, bound)
    return w, b


def _init_batchnorm(key, d, dtype=jnp.float32):
    km, kv = jax.random.split(key)
    gamma = jnp.ones((d,), dtype)
    beta = jnp.zeros((d,), dtype)
    running_mean = 0.1 * jax.random.normal(km, (d,), dtype)
    running_var = 1.0 + 0.1 * jax.random.uniform(kv, (d,), dtype)
    return gamma, beta, running_mean, running_var


def make_block_params(key, in_dim, out_dim, hidden_dims=(), reverse=False):
    """Parameters of Block(in_dim, out_dim, hidden_dims, reverse=reverse)."""
    if reverse:
        out_dim, in_dim = in_dim, out_dim
        hidden_dims = list(reversed(hidden_dims))
    dims = [in_dim] + list(hidden_dims)

    base = []
    for d_in, d_out in zip(dims, dims[1:]):
        key, k_lin, k_bn = jax.random.split(key, 3)
        w, b = _init_linear(k_lin, d_in, d_out)
        gamma, beta, r_mean, r_var = _init_batchnorm(k_bn, d_out)
        base.append(dict(w=w, b=b, gamma=gamma, beta=beta,
                         running_mean=r_mean, running_var=r_var))

    key, k_head = jax.random.split(key)
    hw, hb = _init_linear(k_head, dims[-1], out_dim)
    return dict(base=base, header=dict(w=hw, b=hb))


def fold_block_params(params, eps=1e-5, weight_dtype=jnp.bfloat16):
    """One-time host-side folding: BN -> weights/bias, transpose, stack & pad.

    Returns (w_stack, b_stack, dins, out_dim):
      w_stack : [sum(round_up(Din_i, 8)), Dout_pad]   weight_dtype (bf16)
      b_stack : [n_layers, 1, Dout_pad]               f32
      dins    : static tuple of true per-layer input dims
    Only the Dout (lane) axis is padded to 128; Din only to a multiple of 8.
    """
    douts = [int(layer["w"].shape[0]) for layer in params["base"]]
    douts.append(int(params["header"]["w"].shape[0]))
    dout_pad = _round_up(max(douts), _LANE)

    w_chunks, b_chunks, dins = [], [], []

    def add_layer(w_t, b):
        din = int(w_t.shape[0])
        dins.append(din)
        din_pad = _round_up(din, _SUBLANE)
        w_p = _pad_axis(_pad_axis(w_t, 0, din_pad), 1, dout_pad).astype(weight_dtype)
        b_p = _pad_axis(b, 0, dout_pad)[None, :].astype(jnp.float32)
        w_chunks.append(w_p)
        b_chunks.append(b_p)

    for layer in params["base"]:
        scale = layer["gamma"] / jnp.sqrt(layer["running_var"] + eps)
        shift = layer["beta"] - layer["running_mean"] * scale
        add_layer(layer["w"].T * scale[None, :],        # fold BN scale into weight cols
                  layer["b"] * scale + shift)           # fold BN into bias

    h = params["header"]
    add_layer(h["w"].T, h["b"])

    w_stack = jnp.concatenate(w_chunks, axis=0)         # [total_rows, Dout_pad]
    b_stack = jnp.stack(b_chunks, axis=0)               # [n_layers, 1, Dout_pad]
    return w_stack, b_stack, tuple(dins), int(h["w"].shape[0])


# ---------------------------------------------------------------------------
# Block forward (single fused Pallas kernel under jit, padded output)
# ---------------------------------------------------------------------------

@functools.partial(jax.jit, static_argnames=("dins",))
def block_forward(w_stack, b_stack, x, dins):
    # x is passed unpadded; output has the padded (lane-dense) width and is sliced
    # exactly once downstream.
    return fused_block_call(x, w_stack, b_stack, dins)


# ---------------------------------------------------------------------------
# Main
# ---------------------------------------------------------------------------

if __name__ == "__main__":
    key = jax.random.PRNGKey(0)
    k_params, k_x = jax.random.split(key)

    # Block(in_dim=32, out_dim=16, hidden_dims=(64, 48)), batch=8.
    batch, in_dim, out_dim = 8, 32, 16
    hidden_dims = (64, 48)

    params = make_block_params(k_params, in_dim, out_dim, hidden_dims)
    w_stack, b_stack, dins, out_dim_real = fold_block_params(params)  # folded once
    x = jax.random.normal(k_x, (batch, in_dim), jnp.float32)

    out_padded = block_forward(w_stack, b_stack, x, dins)
    out_padded = jax.block_until_ready(out_padded)
    out = out_padded[:, :out_dim_real]          # single downstream slice

    # Pure-JAX f32 reference (unfolded BN, PyTorch eval semantics). Kernel uses bf16
    # matmul operands with f32 accumulation, so tolerance is ~1e-2-level by design.
    def ref_forward(params, x, eps=1e-5):
        for layer in params["base"]:
            y = x @ layer["w"].T + layer["b"]
            y = (y - layer["running_mean"]) / jnp.sqrt(layer["running_var"] + eps)
            y = y * layer["gamma"] + layer["beta"]
            x = jnp.maximum(y, 0.0)
        h = params["header"]
        return x @ h["w"].T + h["b"]

    ref = ref_forward(params, x)
    assert out.shape == (batch, out_dim)
    max_err = float(jnp.max(jnp.abs(out - ref)))
    assert jnp.allclose(out, ref, atol=5e-2, rtol=5e-2), f"max abs err {max_err}"

    print("KERNEL_OK")
</pallas_src>

<mosaic_0001>
module attributes {stable_mosaic.version = 11 : i64} {
  func.func @kernel(%arg0: memref<8x32xf32, #tpu.memory_space<vmem>>, %arg1: memref<144x128xbf16, #tpu.memory_space<vmem>>, %arg2: memref<3x1x128xf32, #tpu.memory_space<vmem>>, %arg3: memref<8x128xf32, #tpu.memory_space<vmem>>) attributes {dimension_semantics = [], scalar_prefetch = 0 : i64, scratch_operands = 0 : i64, tpu.core_type = #tpu.core_type<tc>} {
    %c0 = arith.constant 0 : index
    %c0_0 = arith.constant 0 : index
    %0 = vector.load %arg0[%c0, %c0_0] : memref<8x32xf32, #tpu.memory_space<vmem>>, vector<8x32xf32>
    %c0_1 = arith.constant 0 : index
    %c0_2 = arith.constant 0 : index
    %1 = vector.load %arg1[%c0_1, %c0_2] : memref<144x128xbf16, #tpu.memory_space<vmem>>, vector<32x128xbf16>
    %2 = arith.truncf %0 : vector<8x32xf32> to vector<8x32xbf16>
    %cst = arith.constant dense<0.000000e+00> : vector<8x128xf32>
    %3 = tpu.matmul %2, %1, %cst {dimension_numbers = #tpu.dot_dimension_numbers<[1], [0], [0], [1], [0, 0, 1, 1], [], []>} : vector<8x32xbf16>, vector<32x128xbf16>, vector<8x128xf32> -> vector<8x128xf32>
    %c0_3 = arith.constant 0 : index
    %c0_4 = arith.constant 0 : index
    %c0_5 = arith.constant 0 : index
    %4 = vector.load %arg2[%c0_3, %c0_4, %c0_5] : memref<3x1x128xf32, #tpu.memory_space<vmem>>, vector<1x1x128xf32>
    %5 = vector.shape_cast %4 : vector<1x1x128xf32> to vector<1x128xf32>
    %6 = vector.broadcast %5 : vector<1x128xf32> to vector<8x128xf32>
    %7 = arith.addf %3, %6 : vector<8x128xf32>
    %cst_6 = arith.constant 0.000000e+00 : f32
    %8 = vector.broadcast %cst_6 : f32 to vector<8x128xf32>
    %9 = arith.maximumf %7, %8 : vector<8x128xf32>
    %c32 = arith.constant 32 : index
    %c0_7 = arith.constant 0 : index
    %10 = vector.load %arg1[%c32, %c0_7] : memref<144x128xbf16, #tpu.memory_space<vmem>>, vector<64x128xbf16>
    %11 = vector.extract_strided_slice %9 {offsets = [0, 0], sizes = [8, 64], strides = [1, 1]} : vector<8x128xf32> to vector<8x64xf32>
    %12 = arith.truncf %11 : vector<8x64xf32> to vector<8x64xbf16>
    %cst_8 = arith.constant dense<0.000000e+00> : vector<8x128xf32>
    %13 = tpu.matmul %12, %10, %cst_8 {dimension_numbers = #tpu.dot_dimension_numbers<[1], [0], [0], [1], [0, 0, 1, 1], [], []>} : vector<8x64xbf16>, vector<64x128xbf16>, vector<8x128xf32> -> vector<8x128xf32>
    %c1 = arith.constant 1 : index
    %c0_9 = arith.constant 0 : index
    %c0_10 = arith.constant 0 : index
    %14 = vector.load %arg2[%c1, %c0_9, %c0_10] : memref<3x1x128xf32, #tpu.memory_space<vmem>>, vector<1x1x128xf32>
    %15 = vector.shape_cast %14 : vector<1x1x128xf32> to vector<1x128xf32>
    %16 = vector.broadcast %15 : vector<1x128xf32> to vector<8x128xf32>
    %17 = arith.addf %13, %16 : vector<8x128xf32>
    %cst_11 = arith.constant 0.000000e+00 : f32
    %18 = vector.broadcast %cst_11 : f32 to vector<8x128xf32>
    %19 = arith.maximumf %17, %18 : vector<8x128xf32>
    %c96 = arith.constant 96 : index
    %c0_12 = arith.constant 0 : index
    %20 = vector.load %arg1[%c96, %c0_12] : memref<144x128xbf16, #tpu.memory_space<vmem>>, vector<48x128xbf16>
    %21 = vector.extract_strided_slice %19 {offsets = [0, 0], sizes = [8, 48], strides = [1, 1]} : vector<8x128xf32> to vector<8x48xf32>
    %22 = arith.truncf %21 : vector<8x48xf32> to vector<8x48xbf16>
    %cst_13 = arith.constant dense<0.000000e+00> : vector<8x128xf32>
    %23 = tpu.matmul %22, %20, %cst_13 {dimension_numbers = #tpu.dot_dimension_numbers<[1], [0], [0], [1], [0, 0, 1, 1], [], []>} : vector<8x48xbf16>, vector<48x128xbf16>, vector<8x128xf32> -> vector<8x128xf32>
    %c2 = arith.constant 2 : index
    %c0_14 = arith.constant 0 : index
    %c0_15 = arith.constant 0 : index
    %24 = vector.load %arg2[%c2, %c0_14, %c0_15] : memref<3x1x128xf32, #tpu.memory_space<vmem>>, vector<1x1x128xf32>
    %25 = vector.shape_cast %24 : vector<1x1x128xf32> to vector<1x128xf32>
    %26 = vector.broadcast %25 : vector<1x128xf32> to vector<8x128xf32>
    %27 = arith.addf %23, %26 : vector<8x128xf32>
    %c0_16 = arith.constant 0 : index
    %c0_17 = arith.constant 0 : index
    %28 = vector.load %arg3[%c0_16, %c0_17] : memref<8x128xf32, #tpu.memory_space<vmem>>, vector<8x128xf32>
    tpu.vector_store %arg3[%c0_16, %c0_17], %27 {strides = array<i32>} : memref<8x128xf32, #tpu.memory_space<vmem>>, vector<8x128xf32>,
    return
  }
}

</mosaic_0001>

<bundles_post_ra>
// kernel: block_forward.1
= control target key start
LH: loop header
LB: loop body
LE: loop exit
PB: predicated region body
PF: predicated region fallthrough
CT: control target
= control target key end

     0   :  { %8 = vsyncpa [#allocation3], 0  ;;  %s521_s0 = inlined_call_operand.hbm [shape: f32[8,32], index: 0, kind: input, shape index: {}]   ;;  %s522_s1 = inlined_call_operand.hbm [shape: bf16[144,128], index: 1, kind: input, shape index: {}]   ;;  %s523_s2 = inlined_call_operand.vmem [shape: f32[3,1,128], index: 2, kind: input, shape index: {}]   ;;  %s524_s3 = inlined_call_operand.hbm [shape: f32[8,128], index: 3, kind: output, shape index: {}]  }
   0x1   :  { %9 = vsyncpa [#allocation6], 0 }
   0x2   :  { %10 = vsyncpa [#allocation4], 0  ;;  %s439_s12 = smov [#allocation2]   ;;  %s440_s14 = smov [#allocation5]  }
   0x3   :  { %s17_s13 = sshll.u32 %s439_s12, 4  ;;  %s26_s15 = sshll.u32 %s440_s14, 4  ;;  %s18_s13 = int_to_ptr.vmem [resolvable:$true] %s17_s13  ;;  %s466_s15 = int_to_ptr.vmem [resolvable:$true] %s26_s15 }
   0x4   :  { %s367_s18 = scalar_lea.hbm %s521_s0, 128 }
   0x5   :  { %p368_p0 = scmp.ne.s32.totalorder %s521_s0, %s367_s18  ;;  %p371_p1 = scmp.lt.u32.totalorder %s367_s18, %s521_s0 }
   0x7   :  { %p373_p2 = pnand %p371_p1, %p368_p0 }
   0x9   :  { %376 = shalt.err (!%p373_p2)
}
   0xa   :  { %s377_s23 = scalar_lea.vmem %s18_s13, 128  ;;  %p382_p4 = scmp.lt.s32.totalorder %s18_s13, %s18_s13 }
   0xb   :  { %p378_p3 = scmp.ne.s32.totalorder %s18_s13, %s377_s23  ;;  %p383_p5 = scmp.lt.s32.totalorder %s377_s23, %s377_s23 }
   0xd   :  { %p384_p6 = por %p383_p5, %p382_p4 }
   0xf   :  { %p385_p7 = pnand %p384_p6, %p378_p3 }
  0x11   :  { %388 = shalt.err (!%p385_p7)
}
  0x12   :  { %20 = dma.hbm_to_vmem [thread:$0]  %s521_s0, 128, %s18_s13, [#allocation3]  }
  0x13   :  { %s389_s28 = scalar_lea.hbm %s522_s1, 1152 }
  0x14   :  { %p390_p8 = scmp.ne.s32.totalorder %s522_s1, %s389_s28  ;;  %p393_p9 = scmp.lt.u32.totalorder %s389_s28, %s522_s1 }
  0x16   :  { %p395_p10 = pnand %p393_p9, %p390_p8 }
  0x18   :  { %398 = shalt.err (!%p395_p10)
}
  0x19   :  { %s399_s6 = scalar_lea.vmem %s466_s15, 1152  ;;  %p404_p12 = scmp.lt.s32.totalorder %s466_s15, %s466_s15 }
  0x1a   :  { %p400_p11 = scmp.ne.s32.totalorder %s466_s15, %s399_s6  ;;  %p405_p13 = scmp.lt.s32.totalorder %s399_s6, %s399_s6 }
  0x1c   :  { %p406_p0 = por %p405_p13, %p404_p12 }
  0x1e   :  { %p407_p1 = pnand %p406_p0, %p400_p11 }
  0x20   :  { %410 = shalt.err (!%p407_p1)
}
  0x21   :  { %s441_s0 = smov 64   ;;  %s442_s7 = smov 4  }
  0x22   :  { %32 = dma.hbm_to_vmem [thread:$0]  %s522_s1, 1152, %s466_s15, [#allocation6], %s441_s0, %s441_s0, %s442_s7  }
  0x23   :  { %433 = dma.done.wait [#allocation3], 128  }
  0x24   :  { %434 = vsyncadd [#allocation3], 4294967168 }
  0x25   :  { %435 = dma.done.wait [#allocation6], 1152  }
  0x26   :  { %436 = vsyncadd [#allocation6], 4294966144  ;;  %v443_v0 = vmov 0.0   ;;  %vm444_vm0 = vmmov 0   ;;  %v358_v1 = vld [vmem:[#allocation5] sm:$0xff]   ;;  %v359_v2 = vld [vmem:[#allocation5 + $0x8] sm:$0xff]  }
  0x27   :  { %321 = vmatprep.subr.bf16.mxu0 %v443_v0  ;;  %325 = vmatprep.mubr.msk.bf16.mxu0 %vm444_vm0, %v443_v0  ;;  %v42_v3 = vld [vmem:[#allocation2] sm:$0xff]  ;;  %v360_v4 = vld [vmem:[#allocation5 + $0x10] sm:$0xff]   ;;  %vm67_vm1 = vcmask 261120   ;;  %v362_v7 = vld [vmem:[#allocation5 + $0x20] sm:$0xff]   ;;  %vm153_vm2 = vcmask 523264   ;;  %vm231_vm3 = vcmask 392192  }
  0x28   :  { %329 = vmatprep.subr.bf16.mxu1 %v443_v0  ;;  %337 = vmatprep.mubr.msk.bf16.mxu1 %vm444_vm0, %v443_v0  ;;  %v361_v5 = vld [vmem:[#allocation5 + $0x18] sm:$0xff]   ;;  %v47_v6 = vpack.c.bf16 %v42_v3, %v42_v3  ;;  %v363_v8 = vld [vmem:[#allocation5 + $0x28] sm:$0xff]   ;;  %v364_v9 = vld [vmem:[#allocation5 + $0x30] sm:$0xff]   ;;  %s445_s15 = smov [#allocation7]  }
  0x29   :  { %322 = vmatpush3.bf16.msra.mxu0 %v358_v1  ;;  %330 = vmatpush3.bf16.msra.mxu1 %v360_v4  ;;  %v292_v10 = vld [vmem:[%s523_s2] ss:$0 sm:$0xff]  ;;  %v366_v19 = vld [vmem:[#allocation5 + $0x40] sm:$0xff]   ;;  %v297_v20 = vld [vmem:[%s523_s2 + $0x1] ss:$0 sm:$0xff]  ;;  %s282_s16 = sshll.u32 %s445_s15, 4  ;;  %s283_s16 = int_to_ptr.vmem [resolvable:$true] %s282_s16 }
  0x2a   :  { %323 = vmatprep.subr.bf16.mxu0 %v443_v0  ;;  %331 = vmatprep.subr.bf16.mxu1 %v443_v0  ;;  %v365_v18 = vld [vmem:[#allocation5 + $0x38] sm:$0xff]   ;;  %s411_s17 = scalar_lea.vmem %s283_s16, 128  ;;  %p416_p3 = scmp.lt.s32.totalorder %s283_s16, %s283_s16 }
  0x2b   :  { %v304_v28 = vld [vmem:[%s523_s2 + $0x2] ss:$0 sm:$0xff]  ;;  %p412_p2 = scmp.ne.s32.totalorder %s283_s16, %s411_s17  ;;  %p417_p4 = scmp.lt.s32.totalorder %s411_s17, %s411_s17 }
  0x2d   :  { %324 = vmatpush3.bf16.msra.mxu0 %v359_v2  ;;  %332 = vmatpush3.bf16.msra.mxu1 %v361_v5  ;;  %p418_p5 = por %p417_p4, %p416_p3 }
  0x2e   :  { %341 = vmatprep.subr.bf16.mxu0 %v443_v0  ;;  %333 = vmatprep.subr.bf16.mxu1 %v443_v0 }
  0x2f   :  { %p419_p6 = pnand %p418_p5, %p412_p2 }
  0x30   :  { %326 = vmatmul.mubr.msk.bf16.vlgmr.msra.gmra.mrb[0].mxu0 %vm67_vm1, %v47_v6 }
  0x31   :  { %347 = vmatprep.mubr.msk.bf16.mxu0 %vm444_vm0, %v443_v0  ;;  %334 = vmatpush3.bf16.msra.mxu1 %v362_v7 }
  0x32   :  { %335 = vmatprep.subr.bf16.mxu1 %v443_v0  ;;  %342 = vmatpush3.bf16.msra.mxu0 %v364_v9 }
  0x33   :  { %343 = vmatprep.subr.bf16.mxu0 %v443_v0 }
  0x35   :  { %336 = vmatpush3.bf16.msra.mxu1 %v363_v8 }
  0x36   :  { %344 = vmatpush3.bf16.msra.mxu0 %v365_v18 }
  0x37   :  { %345 = vmatprep.subr.bf16.mxu0 %v443_v0 }
  0x3a   :  { %346 = vmatpush3.bf16.msra.mxu0 %v366_v19 }
 0x103   :  { %v105_v11 = vpop.f32.mrb[0].mxu0 }
 0x104   :  { %v106_v12 = vadd.f32 %v292_v10, %v105_v11  ;;  %v327_v13 = vpop.f32.mrb[1].mxu0 }
 0x105   :  { %v108_v14 = vpop.f32.mrb[2].mxu0 }
 0x106   :  { %v111_v15 = vmax.f32 %v106_v12, 0.0  ;;  %v328_v16 = vpop.f32.mrb[3].mxu0 }
 0x108   :  { %v120_v17 = vpack.c.bf16 %v111_v15, %v111_v15 }
 0x10a   :  { %338 = vmatmul.mubr.msk.bf16.vlgmr.msra.gmra.mrb[0].mxu1 %vm153_vm2, %v120_v17 }
 0x1dd   :  { %v191_v21 = vpop.f32.mrb[0].mxu1 }
 0x1de   :  { %v192_v22 = vadd.f32 %v297_v20, %v191_v21  ;;  %v339_v23 = vpop.f32.mrb[1].mxu1 }
 0x1df   :  { %v194_v24 = vpop.f32.mrb[2].mxu1 }
 0x1e0   :  { %v197_v25 = vmax.f32 %v192_v22, 0.0  ;;  %v340_v26 = vpop.f32.mrb[3].mxu1 }
 0x1e2   :  { %v204_v27 = vpack.c.bf16 %v197_v25, %v197_v25 }
 0x1e4   :  { %348 = vmatmul.mubr.msk.bf16.vlgmr.msra.gmra.mrb[4].mxu0 %vm231_vm3, %v204_v27 }
 0x2b7   :  { %v269_v29 = vpop.f32.mrb[4].mxu0 }
 0x2b8   :  { %v270_v30 = vadd.f32 %v304_v28, %v269_v29  ;;  %v349_v31 = vpop.f32.mrb[5].mxu0 }
 0x2b9   :  { %v272_v32 = vpop.f32.mrb[6].mxu0 }
 0x2ba   :  { %275 = vst [vmem:[#allocation7] sm:$0xff] %v270_v30  ;;  %v350_v33 = vpop.f32.mrb[7].mxu0 }
 0x2bb   :  { %422 = shalt.err (!%p419_p6)
}
 0x2bc   :  { %s423_s2 = scalar_lea.hbm %s524_s3, 128 }
 0x2bd   :  { %p424_p7 = scmp.ne.s32.totalorder %s524_s3, %s423_s2  ;;  %p427_p8 = scmp.lt.u32.totalorder %s423_s2, %s524_s3 }
 0x2bf   :  { %p429_p9 = pnand %p427_p8, %p424_p7 }
 0x2c1   :  { %432 = shalt.err (!%p429_p9)
}
 0x2c2   :  { %285 = dma.vmem_to_hbm [thread:$0]  %s283_s16, 128, %s524_s3, [#allocation4]  }
 0x2c3   :  { %437 = dma.done.wait [#allocation4], 128  }
 0x2c4   :  { %438 = vsyncadd [#allocation4], 4294967168 }
 0x2c5   :  { %289 = vsyncpa [#allocation3], 1 }
 0x2c6   :  { %290 = vsyncpa [#allocation6], 1 }
 0x2c7   :  { %291 = vsyncpa [#allocation4], 1 }

</bundles_post_ra>
